<compile_context>
chip_gen: v5e
topology: v5e:2x2
jax: 0.10.0
libtpu: 0.0.40
codegen_flags: <defaults>
</compile_context>

<pallas_src>
import math
import functools

import jax
import jax.numpy as jnp
from jax import lax
from jax.experimental import pallas as pl
from jax.experimental.pallas import tpu as pltpu


def _ru8(n):
    """Round up to a multiple of 8 (sublane alignment for slab segments)."""
    return (n + 7) // 8 * 8


def spline_mha_kernel(x_ref, p_ref, attn_ref, wts_ref, o_acc,
                      *, num_heads, d_k, bs, seq, out_size, offsets):
    H, dk, S, L = num_heads, d_k, seq, out_size
    E = H * dk
    Din = x_ref.shape[1]
    o_bkv, o_wo, o_bo, o_q = offsets

    # ---- unpack the single parameter slab (static, 8-row aligned slices) ---
    wkv = p_ref[0:Din, :]                 # (Din, 2E) fused k|v projection weight
    bkv = p_ref[o_bkv:o_bkv + 1, :]       # (1, 2E)   fused k|v projection bias
    woT = p_ref[o_wo:o_wo + E, 0:E]       # (E, E)    out-proj weight, pre-transposed
    b_o = p_ref[o_bo:o_bo + 1, 0:E]       # (1, E)    out-proj bias
    q   = p_ref[o_q:o_q + L, 0:E]         # (L, E)    in-projected, 1/sqrt(dk)-scaled query

    # ---- fused k/v projection: one flat MXU matmul --------------------------
    x = x_ref[...]                                                   # (bs*S, Din)
    kv = jnp.dot(x, wkv, preferred_element_type=jnp.float32) + bkv   # (bs*S, 2E)

    dn_qkT = (((1,), (1,)), ((), ()))     # contract dk of q with dk of k  (A @ B.T)
    inv_h = 1.0 / H

    wts_acc = [None] * bs
    for h in range(H):                    # static unroll, H tiny
        q_h = q[:, h * dk:(h + 1) * dk]                              # (L, dk)
        k_h = kv[:, h * dk:(h + 1) * dk]                             # (bs*S, dk)
        # One score push per head; batch is folded into the N dimension.
        s_h = lax.dot_general(q_h, k_h, dn_qkT,
                              preferred_element_type=jnp.float32)    # (L, bs*S)
        for b in range(bs):               # static unroll, bs tiny
            s = s_h[:, b * S:(b + 1) * S]                            # (L, S)
            s = s - jnp.max(s, axis=-1, keepdims=True)
            e = jnp.exp(s)
            p = e / jnp.sum(e, axis=-1, keepdims=True)               # exact softmax
            v = kv[b * S:(b + 1) * S, E + h * dk:E + (h + 1) * dk]   # (S, dk)
            # Concat-heads layout assembled via masked stores into VMEM scratch.
            o_acc[b * L:(b + 1) * L, h * dk:(h + 1) * dk] = jnp.dot(
                p, v, preferred_element_type=jnp.float32)
            pw = p * inv_h
            wts_acc[b] = pw if wts_acc[b] is None else wts_acc[b] + pw

    # ---- single concat-heads out-projection (one MXU push) ------------------
    out = jnp.dot(o_acc[...], woT, preferred_element_type=jnp.float32) + b_o
    attn_ref[...] = out.astype(attn_ref.dtype)                       # (bs*L, E)

    for b in range(bs):
        wts_ref[b * L:(b + 1) * L, :] = wts_acc[b].astype(wts_ref.dtype)


def spline_multihead(x, params, *, num_heads, d_k, out_size):
    bs, S, Din = x.shape
    E = num_heads * d_k
    L = out_size

    w_in, b_in = params["w_in"], params["b_in"]                   # (3E, E), (3E,)
    wq_in, wk_in, wv_in = w_in[:E], w_in[E:2 * E], w_in[2 * E:]
    bq_in, bk_in, bv_in = b_in[:E], b_in[E:2 * E], b_in[2 * E:]

    # Exact affine fusion: two stacked Linears compose into one affine map.
    wk_f = (wk_in @ params["wk_proj"]).T                           # (Din, E)
    bk_f = params["bk_proj"] @ wk_in.T + bk_in                     # (E,)
    wv_f = (wv_in @ params["wv_proj"]).T                           # (Din, E)
    bv_f = params["bv_proj"] @ wv_in.T + bv_in                     # (E,)

    # Hoisted batch-invariant q in-projection, pre-scaled by 1/sqrt(dk).
    q_s = (params["query"] @ wq_in.T + bq_in) * (1.0 / math.sqrt(d_k))  # (L, E)

    # ---- pack everything except x into one parameter slab (one DMA) --------
    o_bkv = _ru8(Din)
    o_wo = _ru8(o_bkv + 1)
    o_bo = _ru8(o_wo + E)
    o_q = _ru8(o_bo + 1)
    rows = o_q + L
    slab = jnp.zeros((rows, 2 * E), jnp.float32)
    slab = slab.at[:Din, :E].set(wk_f)
    slab = slab.at[:Din, E:].set(wv_f)
    slab = slab.at[o_bkv, :E].set(bk_f)
    slab = slab.at[o_bkv, E:].set(bv_f)
    slab = slab.at[o_wo:o_wo + E, :E].set(params["w_out"].T)
    slab = slab.at[o_bo, :E].set(params["b_out"])
    slab = slab.at[o_q:o_q + L, :E].set(q_s)

    x_flat = x.reshape(bs * S, Din)

    kernel = functools.partial(
        spline_mha_kernel, num_heads=num_heads, d_k=d_k, bs=bs, seq=S,
        out_size=out_size, offsets=(o_bkv, o_wo, o_bo, o_q))

    M = bs * S
    flops = 2 * (M * Din * 2 * E                 # fused k/v projection
                 + num_heads * L * d_k * M       # scores (batch folded into N)
                 + num_heads * bs * L * S * d_k  # probs @ v
                 + bs * L * E * E)               # out projection
    transcendentals = num_heads * bs * L * S
    bytes_accessed = 4 * (x_flat.size + slab.size + bs * L * E + bs * L * S)

    attn2, wts2 = pl.pallas_call(
        kernel,
        out_shape=(jax.ShapeDtypeStruct((bs * L, E), jnp.float32),
                   jax.ShapeDtypeStruct((bs * L, S), jnp.float32)),
        scratch_shapes=[pltpu.VMEM((bs * L, E), jnp.float32)],
        cost_estimate=pl.CostEstimate(flops=flops,
                                      transcendentals=transcendentals,
                                      bytes_accessed=bytes_accessed),
    )(x_flat, slab)

    # Matches PyTorch: attention.view(bs, out_size, -1, num_heads); wts (bs, L, S).
    return attn2.reshape(bs, L, d_k, num_heads), wts2.reshape(bs, L, S)


def reference(x, params, num_heads, d_k, out_size):
    """Pure-JAX reference mirroring the PyTorch forward pass."""
    bs, S, Din = x.shape
    E = num_heads * d_k
    key = x @ params["wk_proj"].T + params["bk_proj"]
    value = x @ params["wv_proj"].T + params["bv_proj"]
    query = jnp.broadcast_to(params["query"][None], (bs, out_size, E))
    w_in, b_in = params["w_in"], params["b_in"]
    q = query @ w_in[:E].T + b_in[:E]
    k = key @ w_in[E:2 * E].T + b_in[E:2 * E]
    v = value @ w_in[2 * E:].T + b_in[2 * E:]

    def split(t):
        B, L, _ = t.shape
        return t.reshape(B, L, num_heads, d_k).transpose(0, 2, 1, 3)

    qh, kh, vh = split(q), split(k), split(v)
    scores = jnp.einsum("bhld,bhsd->bhls", qh, kh) / math.sqrt(d_k)
    p = jax.nn.softmax(scores, axis=-1)
    o = jnp.einsum("bhls,bhsd->bhld", p, vh)
    o = o.transpose(0, 2, 1, 3).reshape(bs, out_size, E)
    out = o @ params["w_out"].T + params["b_out"]
    wts = p.mean(axis=1)
    return out.reshape(bs, out_size, d_k, num_heads), wts


if __name__ == "__main__":
    # Small shapes consistent with the module's forward:
    #   x: (bs, seq, input_dim), num_heads=2, d_k=8 -> embed E=16, out_size=8
    bs, S, Din = 2, 8, 16
    num_heads, d_k, out_size = 2, 8, 8
    E = num_heads * d_k

    root = jax.random.PRNGKey(0)
    ks = jax.random.split(root, 10)

    def uni(k, shape, fan_in):
        bound = 1.0 / math.sqrt(fan_in)
        return jax.random.uniform(k, shape, jnp.float32, -bound, bound)

    params = {
        "wk_proj": uni(ks[0], (E, Din), Din),
        "bk_proj": uni(ks[1], (E,), Din),
        "wv_proj": uni(ks[2], (E, Din), Din),
        "bv_proj": uni(ks[3], (E,), Din),
        # self.query: kaiming_uniform(a=sqrt(5)); synthetic deterministic init
        "query": uni(ks[4], (out_size, E), E),
        "w_in": uni(ks[5], (3 * E, E), E),
        "b_in": uni(ks[6], (3 * E,), E),
        "w_out": uni(ks[7], (E, E), E),
        "b_out": uni(ks[8], (E,), E),
    }
    x = jax.random.normal(ks[9], (bs, S, Din), jnp.float32)

    fn = jax.jit(functools.partial(spline_multihead, num_heads=num_heads,
                                   d_k=d_k, out_size=out_size))
    attn, wts = fn(x, params)
    jax.block_until_ready((attn, wts))

    ref_attn, ref_wts = reference(x, params, num_heads, d_k, out_size)
    assert attn.shape == (bs, out_size, d_k, num_heads)
    assert wts.shape == (bs, out_size, S)
    assert jnp.allclose(attn, ref_attn, atol=1e-2, rtol=1e-2)
    assert jnp.allclose(wts, ref_wts, atol=1e-2, rtol=1e-2)

    print("KERNEL_OK")
</pallas_src>

<mosaic_0001>
module attributes {stable_mosaic.version = 11 : i64} {
  func.func @spline_mha_kernel(%arg0: memref<16x16xf32, #tpu.memory_space<vmem>>, %arg1: memref<56x32xf32, #tpu.memory_space<vmem>>, %arg2: memref<16x16xf32, #tpu.memory_space<vmem>>, %arg3: memref<16x8xf32, #tpu.memory_space<vmem>>, %arg4: memref<16x16xf32, #tpu.memory_space<vmem>>) attributes {dimension_semantics = [], scalar_prefetch = 0 : i64, scratch_operands = 1 : i64, tpu.core_type = #tpu.core_type<tc>} {
    %c0 = arith.constant 0 : index
    %c0_0 = arith.constant 0 : index
    %0 = vector.load %arg1[%c0, %c0_0] : memref<56x32xf32, #tpu.memory_space<vmem>>, vector<16x32xf32>
    %c16 = arith.constant 16 : index
    %c0_1 = arith.constant 0 : index
    %1 = vector.load %arg1[%c16, %c0_1] : memref<56x32xf32, #tpu.memory_space<vmem>>, vector<1x32xf32>
    %c24 = arith.constant 24 : index
    %c0_2 = arith.constant 0 : index
    %2 = vector.load %arg1[%c24, %c0_2] : memref<56x32xf32, #tpu.memory_space<vmem>>, vector<16x16xf32>
    %c40 = arith.constant 40 : index
    %c0_3 = arith.constant 0 : index
    %3 = vector.load %arg1[%c40, %c0_3] : memref<56x32xf32, #tpu.memory_space<vmem>>, vector<1x16xf32>
    %c48 = arith.constant 48 : index
    %c0_4 = arith.constant 0 : index
    %4 = vector.load %arg1[%c48, %c0_4] : memref<56x32xf32, #tpu.memory_space<vmem>>, vector<8x16xf32>
    %c0_5 = arith.constant 0 : index
    %c0_6 = arith.constant 0 : index
    %5 = vector.load %arg0[%c0_5, %c0_6] : memref<16x16xf32, #tpu.memory_space<vmem>>, vector<16x16xf32>
    %cst = arith.constant dense<0.000000e+00> : vector<16x32xf32>
    %6 = tpu.matmul %5, %0, %cst {dimension_numbers = #tpu.dot_dimension_numbers<[1], [0], [0], [1], [0, 0, 1, 1], [], []>} : vector<16x16xf32>, vector<16x32xf32>, vector<16x32xf32> -> vector<16x32xf32>
    %7 = vector.broadcast %1 : vector<1x32xf32> to vector<16x32xf32>
    %8 = arith.addf %6, %7 : vector<16x32xf32>
    %9 = vector.extract_strided_slice %4 {offsets = [0, 0], sizes = [8, 8], strides = [1, 1]} : vector<8x16xf32> to vector<8x8xf32>
    %10 = vector.extract_strided_slice %8 {offsets = [0, 0], sizes = [16, 8], strides = [1, 1]} : vector<16x32xf32> to vector<16x8xf32>
    %cst_7 = arith.constant dense<0.000000e+00> : vector<8x16xf32>
    %11 = tpu.matmul %9, %10, %cst_7 {dimension_numbers = #tpu.dot_dimension_numbers<[1], [1], [0], [0], [0, 0, 1, 0], [], []>} : vector<8x8xf32>, vector<16x8xf32>, vector<8x16xf32> -> vector<8x16xf32>
    %12 = vector.extract_strided_slice %11 {offsets = [0, 0], sizes = [8, 8], strides = [1, 1]} : vector<8x16xf32> to vector<8x8xf32>
    %cst_8 = arith.constant dense<0xFF800000> : vector<8xf32>
    %13 = vector.multi_reduction <maximumf>, %12, %cst_8 [1] : vector<8x8xf32> to vector<8xf32>
    %14 = vector.shape_cast %13 : vector<8xf32> to vector<8x1xf32>
    %15 = vector.broadcast %14 : vector<8x1xf32> to vector<8x8xf32>
    %16 = arith.subf %12, %15 : vector<8x8xf32>
    %17 = math.exp %16 : vector<8x8xf32>
    %cst_9 = arith.constant dense<0.000000e+00> : vector<8xf32>
    %18 = vector.multi_reduction <add>, %17, %cst_9 [1] : vector<8x8xf32> to vector<8xf32>
    %19 = vector.shape_cast %18 : vector<8xf32> to vector<8x1xf32>
    %20 = vector.broadcast %19 : vector<8x1xf32> to vector<8x8xf32>
    %21 = arith.divf %17, %20 : vector<8x8xf32>
    %22 = vector.extract_strided_slice %8 {offsets = [0, 16], sizes = [8, 8], strides = [1, 1]} : vector<16x32xf32> to vector<8x8xf32>
    %cst_10 = arith.constant dense<0.000000e+00> : vector<8x8xf32>
    %23 = tpu.matmul %21, %22, %cst_10 {dimension_numbers = #tpu.dot_dimension_numbers<[1], [0], [0], [1], [0, 0, 1, 1], [], []>} : vector<8x8xf32>, vector<8x8xf32>, vector<8x8xf32> -> vector<8x8xf32>
    %c0_11 = arith.constant 0 : index
    %c0_12 = arith.constant 0 : index
    %24 = vector.load %arg4[%c0_11, %c0_12] : memref<16x16xf32, #tpu.memory_space<vmem>>, vector<8x8xf32>
    tpu.vector_store %arg4[%c0_11, %c0_12], %23 {strides = array<i32>} : memref<16x16xf32, #tpu.memory_space<vmem>>, vector<8x8xf32>,
    %cst_13 = arith.constant 5.000000e-01 : f32
    %25 = vector.broadcast %cst_13 : f32 to vector<8x8xf32>
    %26 = arith.mulf %21, %25 : vector<8x8xf32>
    %27 = vector.extract_strided_slice %11 {offsets = [0, 8], sizes = [8, 8], strides = [1, 1]} : vector<8x16xf32> to vector<8x8xf32>
    %cst_14 = arith.constant dense<0xFF800000> : vector<8xf32>
    %28 = vector.multi_reduction <maximumf>, %27, %cst_14 [1] : vector<8x8xf32> to vector<8xf32>
    %29 = vector.shape_cast %28 : vector<8xf32> to vector<8x1xf32>
    %30 = vector.broadcast %29 : vector<8x1xf32> to vector<8x8xf32>
    %31 = arith.subf %27, %30 : vector<8x8xf32>
    %32 = math.exp %31 : vector<8x8xf32>
    %cst_15 = arith.constant dense<0.000000e+00> : vector<8xf32>
    %33 = vector.multi_reduction <add>, %32, %cst_15 [1] : vector<8x8xf32> to vector<8xf32>
    %34 = vector.shape_cast %33 : vector<8xf32> to vector<8x1xf32>
    %35 = vector.broadcast %34 : vector<8x1xf32> to vector<8x8xf32>
    %36 = arith.divf %32, %35 : vector<8x8xf32>
    %37 = vector.extract_strided_slice %8 {offsets = [8, 16], sizes = [8, 8], strides = [1, 1]} : vector<16x32xf32> to vector<8x8xf32>
    %cst_16 = arith.constant dense<0.000000e+00> : vector<8x8xf32>
    %38 = tpu.matmul %36, %37, %cst_16 {dimension_numbers = #tpu.dot_dimension_numbers<[1], [0], [0], [1], [0, 0, 1, 1], [], []>} : vector<8x8xf32>, vector<8x8xf32>, vector<8x8xf32> -> vector<8x8xf32>
    %c8 = arith.constant 8 : index
    %c0_17 = arith.constant 0 : index
    %39 = vector.load %arg4[%c8, %c0_17] : memref<16x16xf32, #tpu.memory_space<vmem>>, vector<8x8xf32>
    tpu.vector_store %arg4[%c8, %c0_17], %38 {strides = array<i32>} : memref<16x16xf32, #tpu.memory_space<vmem>>, vector<8x8xf32>,
    %cst_18 = arith.constant 5.000000e-01 : f32
    %40 = vector.broadcast %cst_18 : f32 to vector<8x8xf32>
    %41 = arith.mulf %36, %40 : vector<8x8xf32>
    %42 = vector.extract_strided_slice %4 {offsets = [0, 8], sizes = [8, 8], strides = [1, 1]} : vector<8x16xf32> to vector<8x8xf32>
    %43 = vector.extract_strided_slice %8 {offsets = [0, 8], sizes = [16, 8], strides = [1, 1]} : vector<16x32xf32> to vector<16x8xf32>
    %cst_19 = arith.constant dense<0.000000e+00> : vector<8x16xf32>
    %44 = tpu.matmul %42, %43, %cst_19 {dimension_numbers = #tpu.dot_dimension_numbers<[1], [1], [0], [0], [0, 0, 1, 0], [], []>} : vector<8x8xf32>, vector<16x8xf32>, vector<8x16xf32> -> vector<8x16xf32>
    %45 = vector.extract_strided_slice %44 {offsets = [0, 0], sizes = [8, 8], strides = [1, 1]} : vector<8x16xf32> to vector<8x8xf32>
    %cst_20 = arith.constant dense<0xFF800000> : vector<8xf32>
    %46 = vector.multi_reduction <maximumf>, %45, %cst_20 [1] : vector<8x8xf32> to vector<8xf32>
    %47 = vector.shape_cast %46 : vector<8xf32> to vector<8x1xf32>
    %48 = vector.broadcast %47 : vector<8x1xf32> to vector<8x8xf32>
    %49 = arith.subf %45, %48 : vector<8x8xf32>
    %50 = math.exp %49 : vector<8x8xf32>
    %cst_21 = arith.constant dense<0.000000e+00> : vector<8xf32>
    %51 = vector.multi_reduction <add>, %50, %cst_21 [1] : vector<8x8xf32> to vector<8xf32>
    %52 = vector.shape_cast %51 : vector<8xf32> to vector<8x1xf32>
    %53 = vector.broadcast %52 : vector<8x1xf32> to vector<8x8xf32>
    %54 = arith.divf %50, %53 : vector<8x8xf32>
    %55 = vector.extract_strided_slice %8 {offsets = [0, 24], sizes = [8, 8], strides = [1, 1]} : vector<16x32xf32> to vector<8x8xf32>
    %cst_22 = arith.constant dense<0.000000e+00> : vector<8x8xf32>
    %56 = tpu.matmul %54, %55, %cst_22 {dimension_numbers = #tpu.dot_dimension_numbers<[1], [0], [0], [1], [0, 0, 1, 1], [], []>} : vector<8x8xf32>, vector<8x8xf32>, vector<8x8xf32> -> vector<8x8xf32>
    %c0_23 = arith.constant 0 : index
    %c8_24 = arith.constant 8 : index
    %57 = vector.load %arg4[%c0_23, %c8_24] : memref<16x16xf32, #tpu.memory_space<vmem>>, vector<8x8xf32>
    tpu.vector_store %arg4[%c0_23, %c8_24], %56 {strides = array<i32>} : memref<16x16xf32, #tpu.memory_space<vmem>>, vector<8x8xf32>,
    %cst_25 = arith.constant 5.000000e-01 : f32
    %58 = vector.broadcast %cst_25 : f32 to vector<8x8xf32>
    %59 = arith.mulf %54, %58 : vector<8x8xf32>
    %60 = arith.addf %26, %59 : vector<8x8xf32>
    %61 = vector.extract_strided_slice %44 {offsets = [0, 8], sizes = [8, 8], strides = [1, 1]} : vector<8x16xf32> to vector<8x8xf32>
    %cst_26 = arith.constant dense<0xFF800000> : vector<8xf32>
    %62 = vector.multi_reduction <maximumf>, %61, %cst_26 [1] : vector<8x8xf32> to vector<8xf32>
    %63 = vector.shape_cast %62 : vector<8xf32> to vector<8x1xf32>
    %64 = vector.broadcast %63 : vector<8x1xf32> to vector<8x8xf32>
    %65 = arith.subf %61, %64 : vector<8x8xf32>
    %66 = math.exp %65 : vector<8x8xf32>
    %cst_27 = arith.constant dense<0.000000e+00> : vector<8xf32>
    %67 = vector.multi_reduction <add>, %66, %cst_27 [1] : vector<8x8xf32> to vector<8xf32>
    %68 = vector.shape_cast %67 : vector<8xf32> to vector<8x1xf32>
    %69 = vector.broadcast %68 : vector<8x1xf32> to vector<8x8xf32>
    %70 = arith.divf %66, %69 : vector<8x8xf32>
    %71 = vector.extract_strided_slice %8 {offsets = [8, 24], sizes = [8, 8], strides = [1, 1]} : vector<16x32xf32> to vector<8x8xf32>
    %cst_28 = arith.constant dense<0.000000e+00> : vector<8x8xf32>
    %72 = tpu.matmul %70, %71, %cst_28 {dimension_numbers = #tpu.dot_dimension_numbers<[1], [0], [0], [1], [0, 0, 1, 1], [], []>} : vector<8x8xf32>, vector<8x8xf32>, vector<8x8xf32> -> vector<8x8xf32>
    %c8_29 = arith.constant 8 : index
    %c8_30 = arith.constant 8 : index
    %73 = vector.load %arg4[%c8_29, %c8_30] : memref<16x16xf32, #tpu.memory_space<vmem>>, vector<8x8xf32>
    tpu.vector_store %arg4[%c8_29, %c8_30], %72 {strides = array<i32>} : memref<16x16xf32, #tpu.memory_space<vmem>>, vector<8x8xf32>,
    %cst_31 = arith.constant 5.000000e-01 : f32
    %74 = vector.broadcast %cst_31 : f32 to vector<8x8xf32>
    %75 = arith.mulf %70, %74 : vector<8x8xf32>
    %76 = arith.addf %41, %75 : vector<8x8xf32>
    %c0_32 = arith.constant 0 : index
    %c0_33 = arith.constant 0 : index
    %77 = vector.load %arg4[%c0_32, %c0_33] : memref<16x16xf32, #tpu.memory_space<vmem>>, vector<16x16xf32>
    %cst_34 = arith.constant dense<0.000000e+00> : vector<16x16xf32>
    %78 = tpu.matmul %77, %2, %cst_34 {dimension_numbers = #tpu.dot_dimension_numbers<[1], [0], [0], [1], [0, 0, 1, 1], [], []>} : vector<16x16xf32>, vector<16x16xf32>, vector<16x16xf32> -> vector<16x16xf32>
    %79 = vector.broadcast %3 : vector<1x16xf32> to vector<16x16xf32>
    %80 = arith.addf %78, %79 : vector<16x16xf32>
    %c0_35 = arith.constant 0 : index
    %c0_36 = arith.constant 0 : index
    %81 = vector.load %arg2[%c0_35, %c0_36] : memref<16x16xf32, #tpu.memory_space<vmem>>, vector<16x16xf32>
    tpu.vector_store %arg2[%c0_35, %c0_36], %80 {strides = array<i32>} : memref<16x16xf32, #tpu.memory_space<vmem>>, vector<16x16xf32>,
    %c0_37 = arith.constant 0 : index
    %c0_38 = arith.constant 0 : index
    %82 = vector.load %arg3[%c0_37, %c0_38] : memref<16x8xf32, #tpu.memory_space<vmem>>, vector<8x8xf32>
    tpu.vector_store %arg3[%c0_37, %c0_38], %60 {strides = array<i32>} : memref<16x8xf32, #tpu.memory_space<vmem>>, vector<8x8xf32>,
    %c8_39 = arith.constant 8 : index
    %c0_40 = arith.constant 0 : index
    %83 = vector.load %arg3[%c8_39, %c0_40] : memref<16x8xf32, #tpu.memory_space<vmem>>, vector<8x8xf32>
    tpu.vector_store %arg3[%c8_39, %c0_40], %76 {strides = array<i32>} : memref<16x8xf32, #tpu.memory_space<vmem>>, vector<8x8xf32>,
    return
  }
}

</mosaic_0001>

<bundles_post_ra>
// kernel: spline_multihead.1
= control target key start
LH: loop header
LB: loop body
LE: loop exit
PB: predicated region body
PF: predicated region fallthrough
CT: control target
= control target key end

     0   :  { %vm24_vm0 = vcmask 130048   ;;  %s609_s0 = inlined_call_operand.vmem [shape: f32[16,16], index: 0, kind: input, shape index: {}]   ;;  %s610_s1 = inlined_call_operand.vmem [shape: f32[56,32], index: 1, kind: input, shape index: {}]   ;;  %s611_s2 = inlined_call_operand.vmem [shape: f32[16,16], index: 2, kind: output, shape index: {0}]   ;;  %s612_s3 = inlined_call_operand.hbm [shape: f32[16,8], index: 3, kind: output, shape index: {1}]  }
   0x1   :  { %v15_v0 = vld [vmem:[%s610_s1 + $0x8] sm:$0xff]  ;;  %v14_v1 = vld [vmem:[%s610_s1] sm:$0xff] }
   0x2   :  { %45 = vmatpush.msra.mxu0 %v15_v0  ;;  %v21_v2 = vld [vmem:[%s609_s0] sm:$0xff] }
   0x3   :  { %9 = vsyncpa [#allocation4], 0  ;;  %v22_v3 = vld [vmem:[%s609_s0 + $0x8] sm:$0xff]  ;;  %v434_v5 = vld [vmem:[%s610_s1 + $0x10] ss:$0 sm:$0xff]  ;;  %vm54_vm1 = vcmask 64512  }
   0x4   :  { %46 = vmatpush.msra.mxu0 %v14_v1  ;;  %s478_s22 = smov 120   ;;  %v20_v9 = vld [vmem:[%s610_s1 + $0x30] sm:$0xff]  ;;  %vm136_vm2 = vcmask 130112   ;;  %s479_s24 = smov 112  }
   0x5   :  { %409 = vmatmul.msk.f32.vlgmr.msra.gmra.mxu0 %vm24_vm0, %v21_v2  ;;  %s480_s25 = smov 104   ;;  %s481_s26 = smov 8  }
   0x6   :  { %s482_s8 = smov [#allocation3]   ;;  %s395_s12 = sshll.u32 %s612_s3, 4  ;;  %s396_s12 = int_to_ptr.hbm [resolvable:$true] %s395_s12 }
   0x7   :  { %s393_s9 = sshll.u32 %s482_s8, 4  ;;  %s394_s9 = int_to_ptr.vmem [resolvable:$true] %s393_s9 }
   0xd   :  { %410 = vmatmul.msk.f32.gmra.mxu0 %vm24_vm0, %v22_v3 }
  0x82   :  { %v48_v4 = vpop.f32.mrf.mxu0 }
  0x83   :  { %v527_v8 = vadd.f32 %v434_v5, %v48_v4 }
  0x8a   :  { %v51_v6 = vpop.f32.mrf.mxu0 }
  0x8b   :  { %v521_v7 = vadd.f32 %v434_v5, %v51_v6 }
  0x8d   :  { %199 = vrot.lane.b32.xlu2 %v521_v7, %s478_s22  ;;  %411 = vmatpush.xpose.msk.msra.mxu1 %vm54_vm1, %v521_v7  ;;  %v429_v40 = vpack.i.bf16 %v521_v7, %v527_v8 }
  0x91   :  { %412 = vmatpush.xpose.msk.msra.mxu1 %vm54_vm1, %v527_v8 }
  0x94   :  { %413 = vmatmul.msk.f32.vlgmr.msra.gmra.mxu1 %vm54_vm1, %v20_v9 }
  0x95   :  { %197 = vrot.lane.b32.xlu2 %v527_v8, %s478_s22 }
  0xe7   :  { %v200_v30 = vpop.permute.xlu2 %199 }
  0xef   :  { %v198_v32 = vpop.permute.xlu2 %197 }
 0x111   :  { %v537_v10 = vpop.f32.mrf.mxu1 }
 0x112   :  { %v137_v11 = vsel %vm136_vm2, %v537_v10, -inf  ;;  %v84_v39 = vsel %vm54_vm1, %v537_v10, -inf }
 0x113   :  { %138 = vmax.xlane.f32.xlu0 %v137_v11 }
 0x186   :  { %v139_v12 = vpop.xlane.xlu0 %138 }
 0x187   :  { %v140_v13 = vsub.f32 %v537_v10, %v139_v12 }
 0x189   :  { %v141_v14 = vmul.f32 1.442695, %v140_v13 }
 0x18b   :  { %436 = vpow2.f32 %v141_v14 }
 0x191   :  { %v437_v15 = vpop.eup %436 }
 0x192   :  { %144 = vrot.lane.b32.xlu0 %v437_v15, %s478_s22 }
 0x204   :  { %v145_v16 = vpop.permute.xlu0 %144 }
 0x205   :  { %v147_v17 = vsel %vm54_vm1, %v145_v16, 0.0 }
 0x206   :  { %148 = vadd.xlane.f32.xlu1 %v147_v17 }
 0x21f   :  { %168 = vrot.lane.b32.xlu1 %v521_v7, %s479_s24 }
 0x279   :  { %v149_v18 = vpop.xlane.xlu1 %148 }
 0x27a   :  { %438 = vrcp.f32 %v149_v18  ;;  %v161_v22 = vand.u32 2147483648, %v149_v18  ;;  %v159_v24 = vand.u32 2147483647, %v149_v18  ;;  %vm155_vm4 = vweird.f32 %v149_v18 }
 0x27c   :  { %v162_v26 = vor.u32 1.1754944e-38, %v161_v22  ;;  %vm160_vm6 = vcmp.eq.f32.partialorder %v159_v24, 8.507059e+37 }
 0x280   :  { %v439_v19 = vpop.eup %438 }
 0x281   :  { %v151_v20 = vmul.f32 %v439_v19, %v149_v18  ;;  %vm156_vm3 = vweird.f32 %v439_v19 }
 0x282   :  { %vm157_vm5 = vmor %vm155_vm4, %vm156_vm3 }
 0x283   :  { %v152_v21 = vsub.f32 1.0, %v151_v20 }
 0x285   :  { %v153_v23 = vmul.f32 %v439_v19, %v152_v21 }
 0x287   :  { %v154_v25 = vadd.f32 %v439_v19, %v153_v23 }
 0x289   :  { %v158_v27 = vsel %vm157_vm5, %v439_v19, %v154_v25 }
 0x28a   :  { %v163_v28 = vsel %vm160_vm6, %v162_v26, %v158_v27 }
 0x28b   :  { %v546_v29 = vmul.f32 %v437_v15, %v163_v28 }
 0x28d   :  { %166 = vrot.lane.b32.xlu2 %v546_v29, %s478_s22 }
 0x291   :  { %v169_v31 = vpop.permute.xlu1 %168 }
 0x292   :  { %188 = vmatpush.msra.mxu3 %v169_v31 }
 0x294   :  { %416 = vmatpush.xpose.msk.msrb.mxu3 %vm54_vm1, %v200_v30 }
 0x295   :  { %195 = vrot.lane.b32.xlu2 %v20_v9, %s478_s22 }
 0x298   :  { %417 = vmatpush.xpose.msk.msrb.mxu3 %vm54_vm1, %v198_v32 }
 0x2e7   :  { %v167_v33 = vpop.permute.xlu2 %166 }
 0x2e8   :  { %415 = vmatmul.msk.f32.vlgmr.msra.gmra.mxu3 %vm54_vm1, %v167_v33 }
 0x2ef   :  { %v196_v34 = vpop.permute.xlu2 %195 }
 0x2f0   :  { %418 = vmatmul.msk.f32.vlgmr.msrb.gmra.mxu3 %vm54_vm1, %v196_v34 }
 0x36b   :  { %v190_v35 = vpop.f32.mrf.mxu3 }
 0x36c   :  { %193 = vst.msk [vmem:[#allocation2 + $0x8] sm:$0xff] %vm54_vm1, %v190_v35 }
 0x373   :  { %v224_v36 = vpop.f32.mrf.mxu3 }
 0x374   :  { %v284_v37 = vsel %vm136_vm2, %v224_v36, -inf  ;;  %v227_v38 = vsel %vm54_vm1, %v224_v36, -inf }
 0x375   :  { %285 = vmax.xlane.f32.xlu0 %v284_v37  ;;  %228 = vmax.xlane.f32.xlu1 %v227_v38 }
 0x37d   :  { %85 = vmax.xlane.f32.xlu0 %v84_v39  ;;  %v194_v39 = vmul.f32 0.5, %v546_v29 }
 0x391   :  { %430 = vrot.lane.b32.xlu0 %v429_v40, %s480_s25 }
 0x3e8   :  { %v286_v41 = vpop.xlane.xlu0 %285  ;;  %v229_v42 = vpop.xlane.xlu1 %228 }
 0x3e9   :  { %v287_v43 = vsub.f32 %v224_v36, %v286_v41  ;;  %v230_v44 = vsub.f32 %v224_v36, %v229_v42 }
 0x3eb   :  { %v288_v45 = vmul.f32 1.442695, %v287_v43  ;;  %v231_v46 = vmul.f32 1.442695, %v230_v44  ;;  %v18_v43 = vld [vmem:[%s610_s1 + $0x20] sm:$0xff]  ;;  %v17_v44 = vld [vmem:[%s610_s1 + $0x18] sm:$0xff] }
 0x3ed   :  { %440 = vpow2.f32 %v288_v45 }
 0x3ee   :  { %442 = vpow2.f32 %v231_v46 }
 0x3f0   :  { %v86_v47 = vpop.xlane.xlu0 %85 }
 0x3f1   :  { %v87_v48 = vsub.f32 %v537_v10, %v86_v47 }
 0x3f3   :  { %v563_v49 = vpop.eup %440  ;;  %v88_v50 = vmul.f32 1.442695, %v87_v48  ;;  %v435_v48 = vld [vmem:[%s610_s1 + $0x28] ss:$0 sm:$0xff]  ;;  %s483_s1 = smov 128  }
 0x3f4   :  { %v443_v51 = vpop.eup %442  ;;  %291 = vrot.lane.b32.xlu2 %v563_v49, %s478_s22 }
 0x3f5   :  { %444 = vpow2.f32 %v88_v50  ;;  %v233_v52 = vsel %vm54_vm1, %v443_v51, 0.0 }
 0x3f6   :  { %234 = vadd.xlane.f32.xlu1 %v233_v52 }
 0x3fb   :  { %v445_v53 = vpop.eup %444 }
 0x3fc   :  { %v90_v54 = vsel %vm54_vm1, %v445_v53, 0.0 }
 0x3fe   :  { %91 = vadd.xlane.f32.xlu1 %v90_v54 }
 0x403   :  { %v431_v55 = vpop.permute.xlu0 %430 }
 0x404   :  { %v432_v56 = vunpack.i.l.bf16 %v431_v55  ;;  %v433_v57 = vunpack.i.h.bf16 %v431_v55 }
 0x406   :  { %272 = vmatpush.msra.mxu3 %v432_v56  ;;  %335 = vmatpush.msrb.mxu1 %v433_v57 }
 0x417   :  { %108 = vrot.lane.b32.xlu1 %v527_v8, %s479_s24 }
 0x44e   :  { %v292_v58 = vpop.permute.xlu2 %291 }
 0x44f   :  { %v294_v59 = vsel %vm54_vm1, %v292_v58, 0.0 }
 0x450   :  { %295 = vadd.xlane.f32.xlu2 %v294_v59 }
 0x469   :  { %v235_v60 = vpop.xlane.xlu1 %234 }
 0x46a   :  { %446 = vrcp.f32 %v235_v60  ;;  %v247_v1 = vand.u32 2147483648, %v235_v60  ;;  %v245_v3 = vand.u32 2147483647, %v235_v60  ;;  %vm241_vm8 = vweird.f32 %v235_v60 }
 0x46c   :  { %v248_v6 = vor.u32 1.1754944e-38, %v247_v1  ;;  %vm246_vm10 = vcmp.eq.f32.partialorder %v245_v3, 8.507059e+37 }
 0x470   :  { %v447_v61 = vpop.eup %446 }
 0x471   :  { %v237_v62 = vmul.f32 %v447_v61, %v235_v60  ;;  %v92_v63 = vpop.xlane.xlu1 %91  ;;  %vm242_vm7 = vweird.f32 %v447_v61 }
 0x472   :  { %448 = vrcp.f32 %v92_v63  ;;  %vm243_vm9 = vmor %vm241_vm8, %vm242_vm7  ;;  %v104_v12 = vand.u32 2147483648, %v92_v63  ;;  %v102_v14 = vand.u32 2147483647, %v92_v63  ;;  %vm98_vm12 = vweird.f32 %v92_v63 }
 0x473   :  { %v238_v0 = vsub.f32 1.0, %v237_v62 }
 0x474   :  { %v105_v16 = vor.u32 1.1754944e-38, %v104_v12  ;;  %vm103_vm14 = vcmp.eq.f32.partialorder %v102_v14, 8.507059e+37 }
 0x475   :  { %v239_v2 = vmul.f32 %v447_v61, %v238_v0 }
 0x477   :  { %v240_v4 = vadd.f32 %v447_v61, %v239_v2 }
 0x478   :  { %v449_v5 = vpop.eup %448 }
 0x479   :  { %v244_v7 = vsel %vm243_vm9, %v447_v61, %v240_v4  ;;  %v94_v8 = vmul.f32 %v449_v5, %v92_v63  ;;  %vm99_vm11 = vweird.f32 %v449_v5 }
 0x47a   :  { %v249_v9 = vsel %vm246_vm10, %v248_v6, %v244_v7  ;;  %vm100_vm13 = vmor %vm98_vm12, %vm99_vm11 }
 0x47b   :  { %v95_v10 = vsub.f32 1.0, %v94_v8  ;;  %v250_v11 = vmul.f32 %v443_v51, %v249_v9 }
 0x47d   :  { %v96_v13 = vmul.f32 %v449_v5, %v95_v10  ;;  %419 = vmatmul.msk.f32.vlgmr.msra.gmra.mxu3 %vm54_vm1, %v250_v11  ;;  %v282_v21 = vmul.f32 0.5, %v250_v11 }
 0x47f   :  { %v97_v15 = vadd.f32 %v449_v5, %v96_v13 }
 0x481   :  { %v101_v17 = vsel %vm100_vm13, %v449_v5, %v97_v15 }
 0x482   :  { %v106_v18 = vsel %vm103_vm14, %v105_v16, %v101_v17 }
 0x483   :  { %v107_v19 = vmul.f32 %v445_v53, %v106_v18 }
 0x485   :  { %v135_v20 = vmul.f32 0.5, %v107_v19 }
 0x487   :  { %v283_v22 = vadd.f32 %v282_v21, %v135_v20 }
 0x489   :  { %v109_v23 = vpop.permute.xlu1 %108  ;;  %381 = vst.msk [vmem:[#allocation3] sm:$0xff] %vm54_vm1, %v283_v22 }
 0x48a   :  { %129 = vmatpush.msra.mxu2 %v109_v23 }
 0x48b   :  { %414 = vmatmul.msk.f32.vlgmr.msra.gmra.mxu2 %vm54_vm1, %v107_v19 }
 0x48c   :  { %370 = vmatpush.msrb.mxu2 %v18_v43 }
 0x48e   :  { %371 = vmatpush.msrb.mxu2 %v17_v44 }
 0x4c3   :  { %v296_v24 = vpop.xlane.xlu2 %295 }
 0x4c4   :  { %450 = vrcp.f32 %v296_v24  ;;  %v308_v28 = vand.u32 2147483648, %v296_v24  ;;  %v306_v31 = vand.u32 2147483647, %v296_v24  ;;  %vm302_vm3 = vweird.f32 %v296_v24 }
 0x4c6   :  { %v309_v33 = vor.u32 1.1754944e-38, %v308_v28  ;;  %vm307_vm5 = vcmp.eq.f32.partialorder %v306_v31, 8.507059e+37 }
 0x4ca   :  { %v451_v25 = vpop.eup %450 }
 0x4cb   :  { %v298_v26 = vmul.f32 %v451_v25, %v296_v24  ;;  %vm303_vm15 = vweird.f32 %v451_v25 }
 0x4cc   :  { %vm304_vm4 = vmor %vm302_vm3, %vm303_vm15 }
 0x4cd   :  { %v299_v27 = vsub.f32 1.0, %v298_v26 }
 0x4cf   :  { %v300_v30 = vmul.f32 %v451_v25, %v299_v27 }
 0x4d1   :  { %v301_v32 = vadd.f32 %v451_v25, %v300_v30 }
 0x4d3   :  { %v305_v34 = vsel %vm304_vm4, %v451_v25, %v301_v32 }
 0x4d4   :  { %v310_v35 = vsel %vm307_vm5, %v309_v33, %v305_v34 }
 0x4d5   :  { %v311_v36 = vmul.f32 %v563_v49, %v310_v35 }
 0x4d7   :  { %313 = vrot.lane.b32.xlu2 %v311_v36, %s478_s22  ;;  %v345_v38 = vmul.f32 0.5, %v311_v36 }
 0x4d9   :  { %v346_v40 = vadd.f32 %v345_v38, %v194_v39 }
 0x500   :  { %v274_v37 = vpop.f32.mrf.mxu3 }
 0x501   :  { %278 = vrot.lane.b32.xlu0 %v274_v37, %s481_s26 }
 0x509   :  { %383 = vrot.lane.b32.xlu0 %v346_v40, %s478_s22 }
 0x50e   :  { %v131_v41 = vpop.f32.mrf.mxu2 }
 0x50f   :  { %134 = vst.msk [vmem:[#allocation2] sm:$0xff] %vm54_vm1, %v131_v41 }
 0x531   :  { %v314_v42 = vpop.permute.xlu2 %313 }
 0x532   :  { %420 = vmatmul.msk.f32.vlgmr.msrb.gmra.mxu1 %vm54_vm1, %v314_v42 }
 0x573   :  { %v279_v29 = vpop.permute.xlu0 %278 }
 0x574   :  { %281 = vst.msk [vmem:[#allocation2] sm:$0xff] %vm136_vm2, %v279_v29 }
 0x57b   :  { %v384_v45 = vpop.permute.xlu0 %383  ;;  %v347_v46 = vld [vmem:[#allocation2] sm:$0xff] }
 0x57c   :  { %386 = vst.msk [vmem:[#allocation3 + $0x8] sm:$0xff] %vm54_vm1, %v384_v45  ;;  %421 = vmatmul.msk.f32.vlgmr.msrb.gmra.mxu2 %vm24_vm0, %v347_v46 }
 0x57d   :  { %401 = dma.vmem_to_hbm [thread:$0]  %s394_s9, 256, %s396_s12, [#allocation4], %s483_s1, %s483_s1, %s481_s26  }
 0x5af   :  { %v337_v47 = vpop.f32.mrf.mxu1 }
 0x5b0   :  { %341 = vrot.lane.b32.xlu2 %v337_v47, %s481_s26 }
 0x5ff   :  { %v373_v49 = vpop.f32.mrf.mxu2 }
 0x600   :  { %v374_v50 = vadd.f32 %v435_v48, %v373_v49 }
 0x602   :  { %379 = vst.msk [vmem:[%s611_s2] sm:$0xff] %vm24_vm0, %v374_v50 }
 0x60a   :  { %v342_v51 = vpop.permute.xlu2 %341 }
 0x60b   :  { %344 = vst.msk [vmem:[#allocation2 + $0x8] sm:$0xff] %vm136_vm2, %v342_v51 }
 0x612   :  { %v348_v52 = vld [vmem:[#allocation2 + $0x8] sm:$0xff] }
 0x613   :  { %422 = vmatmul.msk.f32.gmra.mxu2 %vm24_vm0, %v348_v52 }
 0x696   :  { %v376_v53 = vpop.f32.mrf.mxu2 }
 0x697   :  { %v377_v54 = vadd.f32 %v435_v48, %v376_v53 }
 0x699   :  { %380 = vst.msk [vmem:[%s611_s2 + $0x8] sm:$0xff] %vm24_vm0, %v377_v54 }
 0x69a   :  { %476 = dma.done.wait [#allocation4], 256  }
 0x69b   :  { %477 = vsyncadd [#allocation4], 4294967040 }
 0x69c   :  { %408 = vsyncpa [#allocation4], 1 }

</bundles_post_ra>
